<compile_context>
chip_gen: v5e
topology: v5e:2x2
jax: 0.10.0
libtpu: 0.0.40
codegen_flags: <defaults>
</compile_context>

<pallas_src>
import functools

import jax
import jax.numpy as jnp
from jax.experimental import pallas as pl
from jax.experimental.pallas import tpu as pltpu


def _round_up(x, m):
    return ((x + m - 1) // m) * m


def _vmem_limits():
    """Return (tile-sizing budget bytes, scoped vmem_limit_bytes) per chip generation."""
    try:
        phys = int(pltpu.get_tpu_info().vmem_capacity_bytes)
    except Exception:
        phys = 128 * 1024 * 1024
    if phys <= 64 * 1024 * 1024:                      # v7x-class: 64 MiB physical per TC
        return 40 * 1024 * 1024, 48 * 1024 * 1024
    return 80 * 1024 * 1024, 96 * 1024 * 1024         # v5e / v6e: 128 MiB physical


def _sublane_multiple(itemsize):
    if itemsize >= 4:
        return 8
    if itemsize == 2:
        return 16                                      # bf16 packs (16,128) per vreg
    return 32


def _choose_tile_n(n, c, itemsize, budget):
    # Per batch row: 2 inputs x 2 pipeline buffers x itemsize  +  ~7 live f32 temporaries.
    per_row = c * (4 * itemsize + 7 * 4)
    t = budget // max(per_row, 1)
    mult = _sublane_multiple(itemsize)
    t = max(mult, (min(int(t), 1024) // mult) * mult)
    return min(t, _round_up(n, mult))


def _consistency_loss_kernel(pred_ref, true_ref, o_ref, acc_ref, *,
                             n_rows, tile_n, inner):
    i = pl.program_id(0)      # core-split axis ("parallel")
    j = pl.program_id(1)      # streaming reduction axis ("arbitrary")

    @pl.when(j == 0)
    def _init():
        acc_ref[...] = jnp.zeros_like(acc_ref)

    p = pred_ref[...].astype(jnp.float32)
    t = true_ref[...].astype(jnp.float32)

    def shifted_exp(x):
        # Single exp pass per input; softmax and log_softmax share exp(x - max).
        m = jnp.max(x, axis=-1, keepdims=True)
        s = x - m
        es = jnp.exp(s)
        den = jnp.sum(es, axis=-1, keepdims=True)
        return s, es, den

    s_p, es_p, den_p = shifted_exp(p)
    s_t, es_t, den_t = shifted_exp(t)

    # Per-row reciprocal on the EUP instead of N*C VALU divides.
    inv_p = pl.reciprocal(den_p, approx=False)
    inv_t = pl.reciprocal(den_t, approx=False)

    # Fused symmetric KL: loss1 + loss2 = sum((soft_p - soft_t) * (log_p - log_t)).
    d_soft = es_p * inv_p - es_t * inv_t
    d_log = (s_p - s_t) + (jnp.log(den_t) - jnp.log(den_p))
    row_sum = jnp.sum(d_soft * d_log, axis=-1, keepdims=True)          # (tile_n, 1)

    # Mask rows past the true batch size (ragged last block / clamped duplicate blocks).
    # Must be a select (jnp.where), not a multiply: garbage rows may hold NaN/Inf.
    tb = i * inner + j                                                  # nominal row-tile idx
    row_idx = tb * tile_n + jax.lax.broadcasted_iota(jnp.int32, row_sum.shape, 0)
    row_sum = jnp.where(row_idx < n_rows, row_sum, 0.0)

    # Vector accumulation; scalar reduce + normalization deferred to finalize / wrapper.
    acc_ref[...] += row_sum

    @pl.when(j == pl.num_programs(1) - 1)
    def _finalize():
        partial = jnp.sum(acc_ref[...])
        o_ref[...] = jnp.full(o_ref.shape, partial, dtype=o_ref.dtype)


def consistency_loss(predicted, true, *, tile_n=None, n_split=2):
    assert predicted.shape == true.shape, "predicted/true must have the same shape"
    assert predicted.ndim == 2, "expected (N, C) logits with softmax over dim=1"
    n, c = predicted.shape
    itemsize = jnp.dtype(predicted.dtype).itemsize

    budget, vmem_limit = _vmem_limits()
    if tile_n is None:
        tile_n = _choose_tile_n(n, c, itemsize, budget)
    mult = _sublane_multiple(itemsize)
    tile_n = max(mult, (int(tile_n) // mult) * mult)
    tile_n = min(tile_n, _round_up(n, mult))

    n_blocks = pl.cdiv(n, tile_n)                # ragged last block: no jnp.pad, mask in kernel
    n_split = max(1, min(int(n_split), n_blocks))
    inner = pl.cdiv(n_blocks, n_split)
    grid = (n_split, inner)

    def in_map(i, j):
        # Clamp so (i, j) combinations past the last row-block re-read the last block;
        # their nominal row indices are >= n, so the in-kernel mask zeroes their contribution.
        return (jnp.minimum(i * inner + j, n_blocks - 1), 0)

    kernel = functools.partial(_consistency_loss_kernel,
                               n_rows=n, tile_n=tile_n, inner=inner)

    out = pl.pallas_call(
        kernel,
        out_shape=jax.ShapeDtypeStruct((n_split * 8, 128), jnp.float32),
        grid_spec=pltpu.PrefetchScalarGridSpec(
            num_scalar_prefetch=0,
            grid=grid,
            in_specs=[
                pl.BlockSpec((tile_n, c), in_map),
                pl.BlockSpec((tile_n, c), in_map),
            ],
            # One lane-dense (8,128) output block per core-split index.
            out_specs=pl.BlockSpec((8, 128), lambda i, j: (i, 0)),
            scratch_shapes=[pltpu.VMEM((tile_n, 1), jnp.float32)],
        ),
        compiler_params=pltpu.CompilerParams(
            dimension_semantics=("parallel", "arbitrary"),
            vmem_limit_bytes=vmem_limit),
    )(predicted, true)

    partials = out[::8, 0]                       # one partial sum per core-split row
    # 'batchmean' normalization with the true batch size.
    return jnp.sum(partials) / jnp.float32(n)


def _reference(predicted, true):
    # Pure-JAX reference matching PyTorch KLDivLoss(reduction='batchmean').
    predicted = predicted.astype(jnp.float32)
    true = true.astype(jnp.float32)
    log_p = jax.nn.log_softmax(predicted, axis=1)
    log_t = jax.nn.log_softmax(true, axis=1)
    soft_p = jnp.exp(log_p)
    soft_t = jnp.exp(log_t)
    n = predicted.shape[0]
    loss1 = jnp.sum(soft_p * (log_p - log_t)) / n
    loss2 = jnp.sum(soft_t * (log_t - log_p)) / n
    return loss1 + loss2


if __name__ == "__main__":
    key = jax.random.PRNGKey(0)
    k1, k2, k3, k4, k5, k6 = jax.random.split(key, 6)

    # Small case matching the module's (N, C) logits (softmax over dim=1).
    N, C = 8, 32
    predicted = jax.random.normal(k1, (N, C), dtype=jnp.float32)
    true = jax.random.normal(k2, (N, C), dtype=jnp.float32)
    loss = consistency_loss(predicted, true)
    jax.block_until_ready(loss)
    ref = _reference(predicted, true)
    assert jnp.allclose(loss, ref, rtol=1e-5, atol=1e-5), (loss, ref)

    # Multi-step grid: dual-core split (2, 2), ragged last block + clamped duplicate block.
    N2, C2 = 20, 128
    p2 = jax.random.normal(k3, (N2, C2), dtype=jnp.float32)
    t2 = jax.random.normal(k4, (N2, C2), dtype=jnp.float32)
    loss2 = consistency_loss(p2, t2, tile_n=8)
    jax.block_until_ready(loss2)
    ref2 = _reference(p2, t2)
    assert jnp.allclose(loss2, ref2, rtol=1e-5, atol=1e-5), (loss2, ref2)

    # bf16 inputs: tile_n rounded to the 16-row sublane-packing multiple, f32 compute path.
    N3, C3 = 32, 256
    p3 = jax.random.normal(k5, (N3, C3), dtype=jnp.float32).astype(jnp.bfloat16)
    t3 = jax.random.normal(k6, (N3, C3), dtype=jnp.float32).astype(jnp.bfloat16)
    loss3 = consistency_loss(p3, t3)
    jax.block_until_ready(loss3)
    ref3 = _reference(p3, t3)
    assert jnp.allclose(loss3, ref3, rtol=1e-4, atol=1e-4), (loss3, ref3)

    print("KERNEL_OK")
</pallas_src>

<mosaic_0001>
module attributes {stable_mosaic.version = 11 : i64} {
  func.func @_consistency_loss_kernel(%arg0: i32, %arg1: i32, %arg2: memref<8x32xf32, #tpu.memory_space<vmem>>, %arg3: memref<8x32xf32, #tpu.memory_space<vmem>>, %arg4: memref<8x128xf32, #tpu.memory_space<vmem>>, %arg5: memref<8x1xf32, #tpu.memory_space<vmem>>) attributes {dimension_semantics = [#tpu.dimension_semantics<parallel>, #tpu.dimension_semantics<arbitrary>], iteration_bounds = array<i64: 1, 1>, scalar_prefetch = 0 : i64, scratch_operands = 1 : i64, tpu.core_type = #tpu.core_type<tc>, window_params = [{transform_indices = @transform_0, window_bounds = array<i64: 8, 32>}, {transform_indices = @transform_1, window_bounds = array<i64: 8, 32>}, {transform_indices = @transform_2, window_bounds = array<i64: 8, 128>}]} {
    %c0_i32 = arith.constant 0 : i32
    %0 = arith.cmpi eq, %arg1, %c0_i32 : i32
    %1 = arith.extui %0 : i1 to i32
    %c0_i32_0 = arith.constant 0 : i32
    %2 = arith.cmpi ne, %1, %c0_i32_0 : i32
    scf.if %2 {
      %cst_16 = arith.constant 0.000000e+00 : f32
      %51 = vector.broadcast %cst_16 : f32 to vector<8x1xf32>
      %c0_17 = arith.constant 0 : index
      %c0_18 = arith.constant 0 : index
      %52 = vector.load %arg5[%c0_17, %c0_18] : memref<8x1xf32, #tpu.memory_space<vmem>>, vector<8x1xf32>
      tpu.vector_store %arg5[%c0_17, %c0_18], %51 {strides = array<i32>} : memref<8x1xf32, #tpu.memory_space<vmem>>, vector<8x1xf32>,
    } else {
    }
    %c0 = arith.constant 0 : index
    %c0_1 = arith.constant 0 : index
    %3 = vector.load %arg2[%c0, %c0_1] : memref<8x32xf32, #tpu.memory_space<vmem>>, vector<8x32xf32>
    %c0_2 = arith.constant 0 : index
    %c0_3 = arith.constant 0 : index
    %4 = vector.load %arg3[%c0_2, %c0_3] : memref<8x32xf32, #tpu.memory_space<vmem>>, vector<8x32xf32>
    %cst = arith.constant dense<0xFF800000> : vector<8xf32>
    %5 = vector.multi_reduction <maximumf>, %3, %cst [1] : vector<8x32xf32> to vector<8xf32>
    %6 = vector.shape_cast %5 : vector<8xf32> to vector<8x1xf32>
    %7 = vector.broadcast %6 : vector<8x1xf32> to vector<8x32xf32>
    %8 = arith.subf %3, %7 : vector<8x32xf32>
    %9 = math.exp %8 : vector<8x32xf32>
    %cst_4 = arith.constant dense<0.000000e+00> : vector<8xf32>
    %10 = vector.multi_reduction <add>, %9, %cst_4 [1] : vector<8x32xf32> to vector<8xf32>
    %11 = vector.shape_cast %10 : vector<8xf32> to vector<8x1xf32>
    %cst_5 = arith.constant dense<0xFF800000> : vector<8xf32>
    %12 = vector.multi_reduction <maximumf>, %4, %cst_5 [1] : vector<8x32xf32> to vector<8xf32>
    %13 = vector.shape_cast %12 : vector<8xf32> to vector<8x1xf32>
    %14 = vector.broadcast %13 : vector<8x1xf32> to vector<8x32xf32>
    %15 = arith.subf %4, %14 : vector<8x32xf32>
    %16 = math.exp %15 : vector<8x32xf32>
    %cst_6 = arith.constant dense<0.000000e+00> : vector<8xf32>
    %17 = vector.multi_reduction <add>, %16, %cst_6 [1] : vector<8x32xf32> to vector<8xf32>
    %18 = vector.shape_cast %17 : vector<8xf32> to vector<8x1xf32>
    %19 = tpu.reciprocal %11 : vector<8x1xf32> -> vector<8x1xf32>
    %20 = tpu.reciprocal %18 : vector<8x1xf32> -> vector<8x1xf32>
    %21 = vector.broadcast %19 : vector<8x1xf32> to vector<8x32xf32>
    %22 = arith.mulf %9, %21 : vector<8x32xf32>
    %23 = vector.broadcast %20 : vector<8x1xf32> to vector<8x32xf32>
    %24 = arith.mulf %16, %23 : vector<8x32xf32>
    %25 = arith.subf %22, %24 : vector<8x32xf32>
    %26 = arith.subf %8, %15 : vector<8x32xf32>
    %27 = math.log %18 : vector<8x1xf32>
    %28 = math.log %11 : vector<8x1xf32>
    %29 = arith.subf %27, %28 : vector<8x1xf32>
    %30 = vector.broadcast %29 : vector<8x1xf32> to vector<8x32xf32>
    %31 = arith.addf %26, %30 : vector<8x32xf32>
    %32 = arith.mulf %25, %31 : vector<8x32xf32>
    %cst_7 = arith.constant dense<0.000000e+00> : vector<8xf32>
    %33 = vector.multi_reduction <add>, %32, %cst_7 [1] : vector<8x32xf32> to vector<8xf32>
    %34 = vector.shape_cast %33 : vector<8xf32> to vector<8x1xf32>
    %c1_i32 = arith.constant 1 : i32
    %35 = arith.muli %arg0, %c1_i32 : i32
    %36 = arith.addi %35, %arg1 : i32
    %c8_i32 = arith.constant 8 : i32
    %37 = arith.muli %36, %c8_i32 : i32
    %38 = tpu.iota {dimensions = array<i32: 0>} : vector<8x1xi32>
    %39 = vector.broadcast %37 : i32 to vector<8x1xi32>
    %40 = arith.addi %39, %38 : vector<8x1xi32>
    %c8_i32_8 = arith.constant 8 : i32
    %41 = vector.broadcast %c8_i32_8 : i32 to vector<8x1xi32>
    %42 = arith.cmpi slt, %40, %41 : vector<8x1xi32>
    %cst_9 = arith.constant 0.000000e+00 : f32
    %43 = vector.broadcast %cst_9 : f32 to vector<8x1xf32>
    %44 = arith.select %42, %34, %43 : vector<8x1xi1>, vector<8x1xf32>
    %c0_10 = arith.constant 0 : index
    %c0_11 = arith.constant 0 : index
    %45 = vector.load %arg5[%c0_10, %c0_11] : memref<8x1xf32, #tpu.memory_space<vmem>>, vector<8x1xf32>
    %46 = arith.addf %45, %44 : vector<8x1xf32>
    %c0_12 = arith.constant 0 : index
    %c0_13 = arith.constant 0 : index
    %47 = vector.load %arg5[%c0_12, %c0_13] : memref<8x1xf32, #tpu.memory_space<vmem>>, vector<8x1xf32>
    tpu.vector_store %arg5[%c0_12, %c0_13], %46 {strides = array<i32>} : memref<8x1xf32, #tpu.memory_space<vmem>>, vector<8x1xf32>,
    %c0_i32_14 = arith.constant 0 : i32
    %48 = arith.cmpi eq, %arg1, %c0_i32_14 : i32
    %49 = arith.extui %48 : i1 to i32
    %c0_i32_15 = arith.constant 0 : i32
    %50 = arith.cmpi ne, %49, %c0_i32_15 : i32
    scf.if %50 {
      %c0_16 = arith.constant 0 : index
      %c0_17 = arith.constant 0 : index
      %51 = vector.load %arg5[%c0_16, %c0_17] : memref<8x1xf32, #tpu.memory_space<vmem>>, vector<8x1xf32>
      %52 = vector.shape_cast %51 : vector<8x1xf32> to vector<1x8x1xf32>
      %cst_18 = arith.constant dense<0.000000e+00> : vector<1xf32>
      %53 = vector.multi_reduction <add>, %52, %cst_18 [1, 2] : vector<1x8x1xf32> to vector<1xf32>
      %54 = vector.shape_cast %53 : vector<1xf32> to vector<1x1x1xf32>
      %55 = vector.extract %54[0, 0, 0] : f32 from vector<1x1x1xf32>
      %56 = vector.broadcast %55 : f32 to vector<8x128xf32>
      %c0_19 = arith.constant 0 : index
      %c0_20 = arith.constant 0 : index
      %57 = vector.load %arg4[%c0_19, %c0_20] : memref<8x128xf32, #tpu.memory_space<vmem>>, vector<8x128xf32>
      tpu.vector_store %arg4[%c0_19, %c0_20], %56 {strides = array<i32>} : memref<8x128xf32, #tpu.memory_space<vmem>>, vector<8x128xf32>,
    } else {
    }
    return
  }
  func.func @transform_0(%arg0: i32, %arg1: i32) -> (i32, i32) {
    %c1_i32 = arith.constant 1 : i32
    %0 = arith.muli %arg0, %c1_i32 : i32
    %1 = arith.addi %0, %arg1 : i32
    %c0_i32 = arith.constant 0 : i32
    %2 = arith.minsi %1, %c0_i32 : i32
    %c0_i32_0 = arith.constant 0 : i32
    %c0_i32_1 = arith.constant 0 : i32
    return %2, %c0_i32_0 : i32, i32
  }
  func.func @transform_1(%arg0: i32, %arg1: i32) -> (i32, i32) {
    %c1_i32 = arith.constant 1 : i32
    %0 = arith.muli %arg0, %c1_i32 : i32
    %1 = arith.addi %0, %arg1 : i32
    %c0_i32 = arith.constant 0 : i32
    %2 = arith.minsi %1, %c0_i32 : i32
    %c0_i32_0 = arith.constant 0 : i32
    %c0_i32_1 = arith.constant 0 : i32
    return %2, %c0_i32_0 : i32, i32
  }
  func.func @transform_2(%arg0: i32, %arg1: i32) -> (i32, i32) {
    %c0_i32 = arith.constant 0 : i32
    %c0_i32_0 = arith.constant 0 : i32
    return %arg0, %c0_i32 : i32, i32
  }
}

</mosaic_0001>

<bundles_post_ra>
// kernel: tpu_custom_call.1
= control target key start
LH: loop header
LB: loop body
LE: loop exit
PB: predicated region body
PF: predicated region fallthrough
CT: control target
= control target key end

     0   :  { %7 = vsyncpa [#allocation4], 0  ;;  %s307_s0 = inlined_call_operand.hbm [shape: f32[8,32], index: 0, kind: input, shape index: {}]   ;;  %s308_s1 = inlined_call_operand.hbm [shape: f32[8,32], index: 1, kind: input, shape index: {}]   ;;  %s309_s2 = inlined_call_operand.hbm [shape: f32[8,128], index: 2, kind: output, shape index: {}]  }
   0x1   :  { %8 = vsyncpa [#allocation7], 0 }
   0x2   :  { %9 = vsyncpa [#allocation5], 0  ;;  %s20_s11 = sshll.u32 %s307_s0, 4  ;;  %s271_s12 = smov [#allocation3]   ;;  %s21_s11 = int_to_ptr.hbm [resolvable:$true] %s20_s11 }
   0x3   :  { %s22_s13 = sshll.u32 %s271_s12, 4  ;;  %s36_s16 = sshll.u32 %s308_s1, 4  ;;  %s23_s13 = int_to_ptr.vmem [resolvable:$true] %s22_s13  ;;  %s37_s16 = int_to_ptr.hbm [resolvable:$true] %s36_s16 }
   0x4   :  { %25 = dma.hbm_to_vmem [thread:$0]  %s21_s11, 128, %s23_s13, [#allocation4]  }
   0x5   :  { %s272_s17 = smov [#allocation6]  }
   0x6   :  { %s38_s18 = sshll.u32 %s272_s17, 4  ;;  %s39_s18 = int_to_ptr.vmem [resolvable:$true] %s38_s18 }
   0x7   :  { %41 = dma.hbm_to_vmem [thread:$0]  %s37_s16, 128, %s39_s18, [#allocation7]  }
   0x8   :  { %265 = dma.done.wait [#allocation4], 128  }
   0x9   :  { %266 = vsyncadd [#allocation4], 4294967168 }
   0xa   :  { %267 = dma.done.wait [#allocation7], 128  }
   0xb   :  { %268 = vsyncadd [#allocation7], 4294967168  ;;  %vm64_vm0 = vcmask 261120   ;;  %v62_v0 = vld [vmem:[#allocation3] sm:$0xff]  ;;  %v63_v2 = vld [vmem:[#allocation6] sm:$0xff]  ;;  %vm60_vm1 = vcmask 7168  }
   0xc   :  { %v65_v1 = vsel %vm64_vm0, %v62_v0, -inf  ;;  %v74_v3 = vsel %vm64_vm0, %v63_v2, -inf  ;;  %v273_v16 = vmov 0.0   ;;  %s160_s19 = sshll.u32 %s309_s2, 4  ;;  %s274_s20 = smov [#allocation8]   ;;  %s161_s19 = int_to_ptr.hbm [resolvable:$true] %s160_s19 }
   0xd   :  { %66 = vmax.xlane.f32.xlu0 %v65_v1  ;;  %61 = vst.msk [vmem:[#allocation2] sm:$0xff] %vm60_vm1, %v273_v16  ;;  %s158_s21 = sshll.u32 %s274_s20, 4  ;;  %s159_s21 = int_to_ptr.vmem [resolvable:$true] %s158_s21 }
  0x14   :  { %v133_v49 = vld [vmem:[#allocation2] sm:$0xff] }
  0x15   :  { %75 = vmax.xlane.f32.xlu0 %v74_v3 }
  0x80   :  { %v67_v4 = vpop.xlane.xlu0 %66 }
  0x81   :  { %v68_v5 = vsub.f32 %v62_v0, %v67_v4 }
  0x83   :  { %v69_v6 = vmul.f32 1.442695, %v68_v5 }
  0x85   :  { %181 = vpow2.f32 %v69_v6 }
  0x88   :  { %v76_v7 = vpop.xlane.xlu0 %75 }
  0x89   :  { %v77_v8 = vsub.f32 %v63_v2, %v76_v7 }
  0x8b   :  { %v182_v9 = vpop.eup %181  ;;  %v78_v10 = vmul.f32 1.442695, %v77_v8  ;;  %v114_v11 = vsub.f32 %v68_v5, %v77_v8 }
  0x8c   :  { %v71_v12 = vsel %vm64_vm0, %v182_v9, 0.0 }
  0x8d   :  { %183 = vpow2.f32 %v78_v10  ;;  %72 = vadd.xlane.f32.xlu1 %v71_v12 }
  0x93   :  { %v184_v13 = vpop.eup %183 }
  0x94   :  { %v80_v14 = vsel %vm64_vm0, %v184_v13, 0.0 }
  0x95   :  { %81 = vadd.xlane.f32.xlu1 %v80_v14 }
 0x100   :  { %v73_v15 = vpop.xlane.xlu1 %72 }
 0x101   :  { %185 = vrcp.f32 %v73_v15  ;;  %v94_v26 = vand.u32 2147483648, %v73_v15  ;;  %vm88_vm3 = vweird.f32 %v73_v15  ;;  %v92_v28 = vand.u32 2147483647, %v73_v15 }
 0x103   :  { %v95_v35 = vor.u32 1.1754944e-38, %v94_v26  ;;  %vm93_vm7 = vcmp.eq.f32.partialorder %v92_v28, 8.507059e+37 }
 0x107   :  { %v186_v17 = vpop.eup %185 }
 0x108   :  { %v84_v18 = vmul.f32 %v186_v17, %v73_v15  ;;  %v82_v19 = vpop.xlane.xlu1 %81  ;;  %vm89_vm2 = vweird.f32 %v186_v17 }
 0x109   :  { %187 = vrcp.f32 %v82_v19  ;;  %v106_v30 = vand.u32 2147483647, %v82_v19  ;;  %v108_v31 = vand.u32 2147483648, %v82_v19  ;;  %vm90_vm4 = vmor %vm88_vm3, %vm89_vm2  ;;  %vm102_vm6 = vweird.f32 %v82_v19 }
 0x10a   :  { %v85_v20 = vsub.f32 1.0, %v84_v18  ;;  %189 = vlog2.f32 %v82_v19 }
 0x10b   :  { %191 = vlog2.f32 %v73_v15  ;;  %v109_v38 = vor.u32 1.1754944e-38, %v108_v31  ;;  %vm107_vm9 = vcmp.eq.f32.partialorder %v106_v30, 8.507059e+37 }
 0x10c   :  { %v86_v21 = vmul.f32 %v186_v17, %v85_v20 }
 0x10e   :  { %v87_v24 = vadd.f32 %v186_v17, %v86_v21 }
 0x10f   :  { %v188_v22 = vpop.eup %187 }
 0x110   :  { %v98_v23 = vmul.f32 %v188_v22, %v82_v19  ;;  %v190_v25 = vpop.eup %189  ;;  %vm103_vm5 = vweird.f32 %v188_v22  ;;  %v91_v33 = vsel %vm90_vm4, %v186_v17, %v87_v24 }
 0x111   :  { %v192_v29 = vpop.eup %191  ;;  %v116_v34 = vmul.f32 0.6931472, %v190_v25  ;;  %vm104_vm8 = vmor %vm102_vm6, %vm103_vm5  ;;  %v96_v39 = vsel %vm93_vm7, %v95_v35, %v91_v33 }
 0x112   :  { %v99_v27 = vsub.f32 1.0, %v98_v23  ;;  %v118_v37 = vmul.f32 0.6931472, %v192_v29  ;;  %v111_v43 = vmul.f32 %v182_v9, %v96_v39 }
 0x114   :  { %v100_v32 = vmul.f32 %v188_v22, %v99_v27  ;;  %v119_v41 = vsub.f32 %v116_v34, %v118_v37 }
 0x116   :  { %v101_v36 = vadd.f32 %v188_v22, %v100_v32  ;;  %v120_v46 = vadd.f32 %v119_v41, %v114_v11 }
 0x118   :  { %v105_v40 = vsel %vm104_vm8, %v188_v22, %v101_v36 }
 0x119   :  { %v110_v42 = vsel %vm107_vm9, %v109_v38, %v105_v40 }
 0x11a   :  { %v112_v44 = vmul.f32 %v184_v13, %v110_v42 }
 0x11c   :  { %v113_v45 = vsub.f32 %v111_v43, %v112_v44 }
 0x11e   :  { %v121_v47 = vmul.f32 %v120_v46, %v113_v45 }
 0x120   :  { %v122_v48 = vsel %vm64_vm0, %v121_v47, 0.0 }
 0x121   :  { %123 = vadd.xlane.f32.xlu2 %v122_v48 }
 0x194   :  { %v124_v50 = vpop.xlane.xlu2 %123 }
 0x195   :  { %v134_v51 = vadd.f32 %v133_v49, %v124_v50 }
 0x197   :  { %136 = vst.msk [vmem:[#allocation2] sm:$0xff] %vm60_vm1, %v134_v51 }
 0x19e   :  { %v140_v52 = vld [vmem:[#allocation2] sm:$0xff] }
 0x19f   :  { %v141_v53 = vsel %vm60_vm1, %v140_v52, 0.0 }
 0x1a0   :  { %142 = vadd.xlane.f32.xlu2 %v141_v53 }
 0x213   :  { %v143_v54 = vpop.xlane.xlu2 %142 }
 0x214   :  { %v144_v55 = vrot.slane %v143_v54, 4 }
 0x216   :  { %v145_v56 = vadd.f32 %v144_v55, %v143_v54 }
 0x218   :  { %v146_v57 = vrot.slane %v145_v56, 2 }
 0x21a   :  { %v147_v58 = vadd.f32 %v146_v57, %v145_v56 }
 0x21c   :  { %v148_v59 = vrot.slane %v147_v58, 1 }
 0x21e   :  { %v149_v60 = vadd.f32 %v148_v59, %v147_v58 }
 0x220   :  { %175 = vpush %v149_v60 }
 0x251   :  { %s176_s22 = spop %175 }
 0x252   :  { %v151_v61 = vstv %s176_s22 }
 0x253   :  { %152 = vst [vmem:[#allocation8] sm:$0xff] %v151_v61 }
 0x254   :  { %163 = dma.vmem_to_hbm [thread:$0]  %s159_s21, 128, %s161_s19, [#allocation5]  }
 0x255   :  { %269 = dma.done.wait [#allocation5], 128  }
 0x256   :  { %270 = vsyncadd [#allocation5], 4294967168 }
 0x257   :  { %168 = vsyncpa [#allocation4], 1 }
 0x258   :  { %169 = vsyncpa [#allocation7], 1 }
 0x259   :  { %170 = vsyncpa [#allocation5], 1 }

</bundles_post_ra>
